<compile_context>
chip_gen: v7x
topology: tpu7x:2x2x1
jax: 0.10.0
libtpu: 0.0.40
codegen_flags: <defaults>
</compile_context>

<pallas_src>
import jax
import jax.numpy as jnp
import numpy as np
from jax.experimental import pallas as pl
from jax.experimental.pallas import tpu as pltpu

LOG_STD_MIN = -20.0
LOG_STD_MAX = 2.0
LANE = 128

_MIN_SUBLANE = 8
_MAX_BATCH_TILE = 2048


def _round_up(x, m):
    return (x + m - 1) // m * m


def _choose_batch_tile(B):
    """Pick (batch_tile, padded_batch).

    - small batches: one step.
    - 256 < B <= 4096: exactly two balanced steps so v7x's two TensorCores
      both get work via the "parallel" batch axis.
    - larger: 2048-row steps to amortize per-grid-step overhead.
    """
    if B <= 256:
        tb = _round_up(B, _MIN_SUBLANE)
    elif B <= 2 * _MAX_BATCH_TILE:
        tb = min(_round_up((B + 1) // 2, 256), _MAX_BATCH_TILE)
    else:
        tb = _MAX_BATCH_TILE
    return tb, _round_up(B, tb)


def actor_kernel(s_ref, w1_ref, b1_ref, w2_ref, b2_ref, wh_ref, bh_ref,
                 lo_ref, hi_ref, head_ref):
    # bf16 inputs to the MXU, f32 accumulation, f32 elementwise.
    x = s_ref[...].astype(jnp.bfloat16)

    # fc1 + relu
    h1 = jnp.dot(x, w1_ref[...], preferred_element_type=jnp.float32) + b1_ref[...]
    h1 = jnp.maximum(h1, 0.0)

    # fc2 + relu
    h2 = jnp.dot(h1.astype(jnp.bfloat16), w2_ref[...],
                 preferred_element_type=jnp.float32) + b2_ref[...]
    h2 = jnp.maximum(h2, 0.0)

    # fused (mean | log_std | zero-pad) head: one matmul, one lane-dense store.
    head = jnp.dot(h2.astype(jnp.bfloat16), wh_ref[...],
                   preferred_element_type=jnp.float32) + bh_ref[...]

    # per-lane clamp: lo/hi are -inf/+inf everywhere except the log_std lanes,
    # where they carry LOG_STD_MIN / LOG_STD_MAX.  Two VPU ops, no iota.
    head = jnp.minimum(jnp.maximum(head, lo_ref[...]), hi_ref[...])

    head_ref[...] = head.astype(head_ref.dtype)


def pack_actor_params(params, action_dim):
    """Pack raw f32 params (w1,b1,w2,b2,wm,bm,ws,bs) into TPU-friendly params:
       - matmul weights cast to bf16 (halves HBM->VMEM bytes, native MXU dtype)
       - mean/log_std head weights fused & zero-padded to a lane-dense width
       - biases kept f32 with shape [1, out]
       - per-lane clamp bound rows (lo, hi) for the fused head."""
    w1, b1, w2, b2, wm, bm, ws, bs = params
    hidden = w1.shape[1]
    head_width = _round_up(max(2 * action_dim, LANE), LANE)

    wh = jnp.zeros((hidden, head_width), jnp.float32)
    wh = wh.at[:, :action_dim].set(wm)
    wh = wh.at[:, action_dim:2 * action_dim].set(ws)
    bh = jnp.zeros((1, head_width), jnp.float32)
    bh = bh.at[:, :action_dim].set(bm.reshape(1, -1))
    bh = bh.at[:, action_dim:2 * action_dim].set(bs.reshape(1, -1))

    lo = np.full((1, head_width), -np.inf, np.float32)
    hi = np.full((1, head_width), np.inf, np.float32)
    lo[:, action_dim:2 * action_dim] = LOG_STD_MIN
    hi[:, action_dim:2 * action_dim] = LOG_STD_MAX

    return (w1.astype(jnp.bfloat16), b1.reshape(1, -1).astype(jnp.float32),
            w2.astype(jnp.bfloat16), b2.reshape(1, -1).astype(jnp.float32),
            wh.astype(jnp.bfloat16), bh.astype(jnp.float32),
            jnp.asarray(lo), jnp.asarray(hi))


def actor_forward(state, packed_params, action_dim, out_dtype=jnp.float32):
    """Returns (mean, log_std), matching Actor.forward semantics.

    `out_dtype=jnp.bfloat16` halves head writeback bytes (useful on v5e) at
    the cost of head precision; default keeps f32."""
    w1, b1, w2, b2, wh, bh, lo, hi = packed_params
    B, state_dim = state.shape
    hidden = w1.shape[1]
    head_width = wh.shape[1]

    tb, B_pad = _choose_batch_tile(B)
    if B_pad != B:
        state = jnp.pad(state, ((0, B_pad - B), (0, 0)))
    grid = (B_pad // tb,)

    # Weights / biases / bounds stay resident across grid steps via constant
    # (0, 0) index maps; only the state rows and head rows stream.
    def resident(shape):
        return pl.BlockSpec(shape, lambda i: (0, 0))

    in_specs = [
        pl.BlockSpec((tb, state_dim), lambda i: (i, 0)),    # state rows
        resident((state_dim, hidden)), resident((1, hidden)),      # fc1
        resident((hidden, hidden)), resident((1, hidden)),         # fc2
        resident((hidden, head_width)), resident((1, head_width)), # fused heads
        resident((1, head_width)), resident((1, head_width)),      # clamp lo/hi
    ]
    out_spec = pl.BlockSpec((tb, head_width), lambda i: (i, 0))

    flops = 2 * B_pad * (state_dim * hidden + hidden * hidden
                         + hidden * head_width)
    bytes_accessed = (
        B_pad * state_dim * 4
        + (w1.size + w2.size + wh.size) * 2
        + (b1.size + b2.size + bh.size + lo.size + hi.size) * 4
        + B_pad * head_width * jnp.dtype(out_dtype).itemsize)

    head = pl.pallas_call(
        actor_kernel,
        out_shape=jax.ShapeDtypeStruct((B_pad, head_width), out_dtype),
        grid=grid,
        in_specs=in_specs,
        out_specs=out_spec,
        compiler_params=pltpu.CompilerParams(
            dimension_semantics=("parallel",),
            vmem_limit_bytes=32 * 1024 * 1024),
        cost_estimate=pl.CostEstimate(
            flops=int(flops), transcendentals=0,
            bytes_accessed=int(bytes_accessed)),
    )(state, w1, b1, w2, b2, wh, bh, lo, hi)

    mean = head[:B, :action_dim]
    log_std = head[:B, action_dim:2 * action_dim]
    return mean, log_std


def init_actor_params(key, state_dim, action_dim, hidden=256):
    """Deterministic init mimicking torch.nn.Linear default (uniform +-1/sqrt(fan_in)).
    Weights stored as [in, out]; biases as [1, out]."""
    keys = jax.random.split(key, 8)

    def lin(kw, kb, fan_in, fan_out):
        bound = 1.0 / jnp.sqrt(jnp.float32(fan_in))
        w = jax.random.uniform(kw, (fan_in, fan_out), jnp.float32, -bound, bound)
        b = jax.random.uniform(kb, (1, fan_out), jnp.float32, -bound, bound)
        return w, b

    w1, b1 = lin(keys[0], keys[1], state_dim, hidden)
    w2, b2 = lin(keys[2], keys[3], hidden, hidden)
    wm, bm = lin(keys[4], keys[5], hidden, action_dim)
    ws, bs = lin(keys[6], keys[7], hidden, action_dim)
    return (w1, b1, w2, b2, wm, bm, ws, bs)


def actor_forward_ref(state, params):
    """Pure-JAX reference mimicking the kernel's bf16-matmul / f32-accumulate path."""
    w1, b1, w2, b2, wm, bm, ws, bs = params

    def mm(x, w):
        return jnp.dot(x.astype(jnp.bfloat16), w.astype(jnp.bfloat16),
                       preferred_element_type=jnp.float32)

    h1 = jnp.maximum(mm(state, w1) + b1, 0.0)
    h2 = jnp.maximum(mm(h1, w2) + b2, 0.0)
    mean = mm(h2, wm) + bm
    log_std = jnp.clip(mm(h2, ws) + bs, LOG_STD_MIN, LOG_STD_MAX)
    return mean, log_std


def _check(batch, state_dim, action_dim, k_param, k_state):
    raw_params = init_actor_params(k_param, state_dim, action_dim)
    packed = pack_actor_params(raw_params, action_dim)
    state = jax.random.normal(k_state, (batch, state_dim), jnp.float32)

    mean, log_std = actor_forward(state, packed, action_dim)
    jax.block_until_ready((mean, log_std))

    mean_ref, log_std_ref = actor_forward_ref(state, raw_params)
    assert mean.shape == (batch, action_dim)
    assert log_std.shape == (batch, action_dim)
    assert jnp.allclose(mean, mean_ref, atol=1e-3, rtol=1e-3)
    assert jnp.allclose(log_std, log_std_ref, atol=1e-3, rtol=1e-3)
    assert jnp.all(log_std >= LOG_STD_MIN) and jnp.all(log_std <= LOG_STD_MAX)


if __name__ == "__main__":
    key = jax.random.PRNGKey(0)
    k_param, k_state = jax.random.split(key)

    state_dim = 16
    action_dim = 4

    # Aligned batch (single grid step, full sublane packing).
    _check(16, state_dim, action_dim, k_param, k_state)
    # Non-multiple-of-8 batch exercises the padded-tile path.
    _check(5, state_dim, action_dim, k_param, k_state)

    print("KERNEL_OK")
</pallas_src>

<mosaic_0001>
module attributes {stable_mosaic.version = 11 : i64} {
  func.func @actor_kernel(%arg0: i32, %arg1: memref<16x16xf32, #tpu.memory_space<vmem>>, %arg2: memref<16x256xbf16, #tpu.memory_space<vmem>>, %arg3: memref<1x256xf32, #tpu.memory_space<vmem>>, %arg4: memref<256x256xbf16, #tpu.memory_space<vmem>>, %arg5: memref<1x256xf32, #tpu.memory_space<vmem>>, %arg6: memref<256x128xbf16, #tpu.memory_space<vmem>>, %arg7: memref<1x128xf32, #tpu.memory_space<vmem>>, %arg8: memref<1x128xf32, #tpu.memory_space<vmem>>, %arg9: memref<1x128xf32, #tpu.memory_space<vmem>>, %arg10: memref<16x128xf32, #tpu.memory_space<vmem>>) attributes {dimension_semantics = [#tpu.dimension_semantics<parallel>], iteration_bounds = array<i64: 1>, scalar_prefetch = 0 : i64, scratch_operands = 0 : i64, tpu.core_type = #tpu.core_type<tc>, window_params = [{transform_indices = @transform_0, window_bounds = array<i64: 16, 16>}, {pipeline_mode = #tpu.pipeline_mode<synchronous>, transform_indices = @transform_1, window_bounds = array<i64: 16, 256>}, {pipeline_mode = #tpu.pipeline_mode<synchronous>, transform_indices = @transform_2, window_bounds = array<i64: 1, 256>}, {pipeline_mode = #tpu.pipeline_mode<synchronous>, transform_indices = @transform_3, window_bounds = array<i64: 256, 256>}, {pipeline_mode = #tpu.pipeline_mode<synchronous>, transform_indices = @transform_4, window_bounds = array<i64: 1, 256>}, {pipeline_mode = #tpu.pipeline_mode<synchronous>, transform_indices = @transform_5, window_bounds = array<i64: 256, 128>}, {pipeline_mode = #tpu.pipeline_mode<synchronous>, transform_indices = @transform_6, window_bounds = array<i64: 1, 128>}, {pipeline_mode = #tpu.pipeline_mode<synchronous>, transform_indices = @transform_7, window_bounds = array<i64: 1, 128>}, {pipeline_mode = #tpu.pipeline_mode<synchronous>, transform_indices = @transform_8, window_bounds = array<i64: 1, 128>}, {transform_indices = @transform_9, window_bounds = array<i64: 16, 128>}]} {
    %c0 = arith.constant 0 : index
    %c0_0 = arith.constant 0 : index
    %0 = vector.load %arg1[%c0, %c0_0] : memref<16x16xf32, #tpu.memory_space<vmem>>, vector<16x16xf32>
    %1 = arith.truncf %0 : vector<16x16xf32> to vector<16x16xbf16>
    %c0_1 = arith.constant 0 : index
    %c0_2 = arith.constant 0 : index
    %2 = vector.load %arg2[%c0_1, %c0_2] : memref<16x256xbf16, #tpu.memory_space<vmem>>, vector<16x256xbf16>
    %cst = arith.constant dense<0.000000e+00> : vector<16x256xf32>
    %3 = tpu.matmul %1, %2, %cst {dimension_numbers = #tpu.dot_dimension_numbers<[1], [0], [0], [1], [0, 0, 1, 1], [], []>} : vector<16x16xbf16>, vector<16x256xbf16>, vector<16x256xf32> -> vector<16x256xf32>
    %c0_3 = arith.constant 0 : index
    %c0_4 = arith.constant 0 : index
    %4 = vector.load %arg3[%c0_3, %c0_4] : memref<1x256xf32, #tpu.memory_space<vmem>>, vector<1x256xf32>
    %5 = vector.broadcast %4 : vector<1x256xf32> to vector<16x256xf32>
    %6 = arith.addf %3, %5 : vector<16x256xf32>
    %cst_5 = arith.constant 0.000000e+00 : f32
    %7 = vector.broadcast %cst_5 : f32 to vector<16x256xf32>
    %8 = arith.maximumf %6, %7 : vector<16x256xf32>
    %9 = arith.truncf %8 : vector<16x256xf32> to vector<16x256xbf16>
    %c0_6 = arith.constant 0 : index
    %c0_7 = arith.constant 0 : index
    %10 = vector.load %arg4[%c0_6, %c0_7] : memref<256x256xbf16, #tpu.memory_space<vmem>>, vector<256x256xbf16>
    %cst_8 = arith.constant dense<0.000000e+00> : vector<16x256xf32>
    %11 = tpu.matmul %9, %10, %cst_8 {dimension_numbers = #tpu.dot_dimension_numbers<[1], [0], [0], [1], [0, 0, 1, 1], [], []>} : vector<16x256xbf16>, vector<256x256xbf16>, vector<16x256xf32> -> vector<16x256xf32>
    %c0_9 = arith.constant 0 : index
    %c0_10 = arith.constant 0 : index
    %12 = vector.load %arg5[%c0_9, %c0_10] : memref<1x256xf32, #tpu.memory_space<vmem>>, vector<1x256xf32>
    %13 = vector.broadcast %12 : vector<1x256xf32> to vector<16x256xf32>
    %14 = arith.addf %11, %13 : vector<16x256xf32>
    %cst_11 = arith.constant 0.000000e+00 : f32
    %15 = vector.broadcast %cst_11 : f32 to vector<16x256xf32>
    %16 = arith.maximumf %14, %15 : vector<16x256xf32>
    %17 = arith.truncf %16 : vector<16x256xf32> to vector<16x256xbf16>
    %c0_12 = arith.constant 0 : index
    %c0_13 = arith.constant 0 : index
    %18 = vector.load %arg6[%c0_12, %c0_13] : memref<256x128xbf16, #tpu.memory_space<vmem>>, vector<256x128xbf16>
    %cst_14 = arith.constant dense<0.000000e+00> : vector<16x128xf32>
    %19 = tpu.matmul %17, %18, %cst_14 {dimension_numbers = #tpu.dot_dimension_numbers<[1], [0], [0], [1], [0, 0, 1, 1], [], []>} : vector<16x256xbf16>, vector<256x128xbf16>, vector<16x128xf32> -> vector<16x128xf32>
    %c0_15 = arith.constant 0 : index
    %c0_16 = arith.constant 0 : index
    %20 = vector.load %arg7[%c0_15, %c0_16] : memref<1x128xf32, #tpu.memory_space<vmem>>, vector<1x128xf32>
    %21 = vector.broadcast %20 : vector<1x128xf32> to vector<16x128xf32>
    %22 = arith.addf %19, %21 : vector<16x128xf32>
    %c0_17 = arith.constant 0 : index
    %c0_18 = arith.constant 0 : index
    %23 = vector.load %arg8[%c0_17, %c0_18] : memref<1x128xf32, #tpu.memory_space<vmem>>, vector<1x128xf32>
    %24 = vector.broadcast %23 : vector<1x128xf32> to vector<16x128xf32>
    %25 = arith.maximumf %22, %24 : vector<16x128xf32>
    %c0_19 = arith.constant 0 : index
    %c0_20 = arith.constant 0 : index
    %26 = vector.load %arg9[%c0_19, %c0_20] : memref<1x128xf32, #tpu.memory_space<vmem>>, vector<1x128xf32>
    %27 = vector.broadcast %26 : vector<1x128xf32> to vector<16x128xf32>
    %28 = arith.minimumf %25, %27 : vector<16x128xf32>
    %c0_21 = arith.constant 0 : index
    %c0_22 = arith.constant 0 : index
    %29 = vector.load %arg10[%c0_21, %c0_22] : memref<16x128xf32, #tpu.memory_space<vmem>>, vector<16x128xf32>
    tpu.vector_store %arg10[%c0_21, %c0_22], %28 {strides = array<i32>} : memref<16x128xf32, #tpu.memory_space<vmem>>, vector<16x128xf32>,
    return
  }
  func.func @transform_0(%arg0: i32) -> (i32, i32) {
    %c0_i32 = arith.constant 0 : i32
    %c0_i32_0 = arith.constant 0 : i32
    return %arg0, %c0_i32 : i32, i32
  }
  func.func @transform_1(%arg0: i32) -> (i32, i32) {
    %c0_i32 = arith.constant 0 : i32
    %c0_i32_0 = arith.constant 0 : i32
    %c0_i32_1 = arith.constant 0 : i32
    return %c0_i32, %c0_i32_0 : i32, i32
  }
  func.func @transform_2(%arg0: i32) -> (i32, i32) {
    %c0_i32 = arith.constant 0 : i32
    %c0_i32_0 = arith.constant 0 : i32
    %c0_i32_1 = arith.constant 0 : i32
    return %c0_i32, %c0_i32_0 : i32, i32
  }
  func.func @transform_3(%arg0: i32) -> (i32, i32) {
    %c0_i32 = arith.constant 0 : i32
    %c0_i32_0 = arith.constant 0 : i32
    %c0_i32_1 = arith.constant 0 : i32
    return %c0_i32, %c0_i32_0 : i32, i32
  }
  func.func @transform_4(%arg0: i32) -> (i32, i32) {
    %c0_i32 = arith.constant 0 : i32
    %c0_i32_0 = arith.constant 0 : i32
    %c0_i32_1 = arith.constant 0 : i32
    return %c0_i32, %c0_i32_0 : i32, i32
  }
  func.func @transform_5(%arg0: i32) -> (i32, i32) {
    %c0_i32 = arith.constant 0 : i32
    %c0_i32_0 = arith.constant 0 : i32
    %c0_i32_1 = arith.constant 0 : i32
    return %c0_i32, %c0_i32_0 : i32, i32
  }
  func.func @transform_6(%arg0: i32) -> (i32, i32) {
    %c0_i32 = arith.constant 0 : i32
    %c0_i32_0 = arith.constant 0 : i32
    %c0_i32_1 = arith.constant 0 : i32
    return %c0_i32, %c0_i32_0 : i32, i32
  }
  func.func @transform_7(%arg0: i32) -> (i32, i32) {
    %c0_i32 = arith.constant 0 : i32
    %c0_i32_0 = arith.constant 0 : i32
    %c0_i32_1 = arith.constant 0 : i32
    return %c0_i32, %c0_i32_0 : i32, i32
  }
  func.func @transform_8(%arg0: i32) -> (i32, i32) {
    %c0_i32 = arith.constant 0 : i32
    %c0_i32_0 = arith.constant 0 : i32
    %c0_i32_1 = arith.constant 0 : i32
    return %c0_i32, %c0_i32_0 : i32, i32
  }
  func.func @transform_9(%arg0: i32) -> (i32, i32) {
    %c0_i32 = arith.constant 0 : i32
    %c0_i32_0 = arith.constant 0 : i32
    return %arg0, %c0_i32 : i32, i32
  }
}

</mosaic_0001>

<bundles_post_ra>
// kernel: tpu_custom_call.1
= control target key start
LH: loop header
LB: loop body
LE: loop exit
PB: predicated region body
PF: predicated region fallthrough
CT: control target
= control target key end

     0   :  { %14 = vsyncpa [#allocation3], 0  ;;  %s1069_s0 = inlined_call_operand.hbm [shape: f32[16,16], index: 0, kind: input, shape index: {}]   ;;  %s1070_s1 = inlined_call_operand.hbm [shape: bf16[16,256], index: 1, kind: input, shape index: {}]   ;;  %s1071_s2 = inlined_call_operand.vmem [shape: f32[1,256], index: 2, kind: input, shape index: {}]   ;;  %s1072_s3 = inlined_call_operand.hbm [shape: bf16[256,256], index: 3, kind: input, shape index: {}]   ;;  %s1073_s4 = inlined_call_operand.vmem [shape: f32[1,256], index: 4, kind: input, shape index: {}]   ;;  %s1074_s5 = inlined_call_operand.hbm [shape: bf16[256,128], index: 5, kind: input, shape index: {}]   ;;  %s1075_s6 = inlined_call_operand.vmem [shape: f32[1,128], index: 6, kind: input, shape index: {}]   ;;  %s1076_s7 = inlined_call_operand.vmem [shape: f32[1,128], index: 7, kind: input, shape index: {}]   ;;  %s1077_s8 = inlined_call_operand.vmem [shape: f32[1,128], index: 8, kind: input, shape index: {}]   ;;  %s1078_s9 = inlined_call_operand.hbm [shape: f32[16,128], index: 9, kind: output, shape index: {}]  }
   0x1   :  { %15 = vsyncpa [#allocation6], 0 }
   0x2   :  { %16 = vsyncpa [#allocation9], 0 }
   0x3   :  { %17 = vsyncpa [#allocation4], 0  ;;  %s908_s30 = smov [#allocation5]   ;;  %s909_s11 = smov [#allocation2]  }
   0x4   :  { %s35_s10 = sshll.u32 %s908_s30, 4  ;;  %s23_s12 = sshll.u32 %s909_s11, 4  ;;  %s36_s10 = int_to_ptr.vmem [resolvable:$true] %s35_s10  ;;  %s968_s12 = int_to_ptr.vmem [resolvable:$true] %s23_s12 }
   0x5   :  { %s790_s15 = scalar_lea.hbm %s1070_s1, 256 }
   0x6   :  { %p791_p0 = scmp.ne.s32.totalorder %s1070_s1, %s790_s15  ;;  %p794_p1 = scmp.lt.u32.totalorder %s790_s15, %s1070_s1 }
   0x8   :  { %p796_p2 = pnand %p794_p1, %p791_p0 }
   0xa   :  { %799 = shalt.err (!%p796_p2)
}
   0xb   :  { %s800_s20 = scalar_lea.vmem %s36_s10, 256  ;;  %p805_p4 = scmp.lt.s32.totalorder %s36_s10, %s36_s10 }
   0xc   :  { %p801_p3 = scmp.ne.s32.totalorder %s36_s10, %s800_s20  ;;  %p806_p5 = scmp.lt.s32.totalorder %s800_s20, %s800_s20 }
   0xe   :  { %p807_p6 = por %p806_p5, %p805_p4 }
  0x10   :  { %p808_p7 = pnand %p807_p6, %p801_p3 }
  0x12   :  { %811 = shalt.err (!%p808_p7)
}
  0x13   :  { %s910_s21 = smov 128   ;;  %s911_s22 = smov 8  }
  0x14   :  { %41 = dma.hbm_to_vmem [thread:$0]  %s1070_s1, 256, %s36_s10, [#allocation6], %s910_s21, %s910_s21, %s911_s22  }
  0x15   :  { %s812_s27 = scalar_lea.hbm %s1069_s0, 256 }
  0x16   :  { %p813_p8 = scmp.ne.s32.totalorder %s1069_s0, %s812_s27  ;;  %p816_p9 = scmp.lt.u32.totalorder %s812_s27, %s1069_s0 }
  0x18   :  { %p818_p10 = pnand %p816_p9, %p813_p8 }
  0x1a   :  { %821 = shalt.err (!%p818_p10)
}
  0x1b   :  { %s822_s13 = scalar_lea.vmem %s968_s12, 256  ;;  %p827_p12 = scmp.lt.s32.totalorder %s968_s12, %s968_s12 }
  0x1c   :  { %p823_p11 = scmp.ne.s32.totalorder %s968_s12, %s822_s13  ;;  %p828_p13 = scmp.lt.s32.totalorder %s822_s13, %s822_s13 }
  0x1e   :  { %p829_p0 = por %p828_p13, %p827_p12 }
  0x20   :  { %p830_p1 = pnand %p829_p0, %p823_p11 }
  0x22   :  { %833 = shalt.err (!%p830_p1)
}
  0x23   :  { %29 = dma.hbm_to_vmem [thread:$0]  %s1069_s0, 256, %s968_s12, [#allocation3], %s910_s21, %s910_s21, %s911_s22  }
  0x24   :  { %s912_s14 = smov [#allocation7]   ;;  %s913_s16 = smov [#allocation8]  }
  0x25   :  { %s49_s15 = sshll.u32 %s912_s14, 4  ;;  %s63_s17 = sshll.u32 %s913_s16, 4  ;;  %s50_s15 = int_to_ptr.vmem [resolvable:$true] %s49_s15  ;;  %s1005_s17 = int_to_ptr.vmem [resolvable:$true] %s63_s17 }
  0x26   :  { %s834_s20 = scalar_lea.hbm %s1072_s3, 4096 }
  0x27   :  { %p835_p2 = scmp.ne.s32.totalorder %s1072_s3, %s834_s20  ;;  %p838_p3 = scmp.lt.u32.totalorder %s834_s20, %s1072_s3 }
  0x29   :  { %p840_p4 = pnand %p838_p3, %p835_p2 }
  0x2b   :  { %843 = shalt.err (!%p840_p4)
}
  0x2c   :  { %s844_s0 = scalar_lea.vmem %s50_s15, 4096  ;;  %p849_p6 = scmp.lt.s32.totalorder %s50_s15, %s50_s15 }
  0x2d   :  { %p845_p5 = scmp.ne.s32.totalorder %s50_s15, %s844_s0  ;;  %p850_p7 = scmp.lt.s32.totalorder %s844_s0, %s844_s0 }
  0x2f   :  { %p851_p8 = por %p850_p7, %p849_p6 }
  0x31   :  { %p852_p9 = pnand %p851_p8, %p845_p5 }
  0x33   :  { %855 = shalt.err (!%p852_p9)
}
  0x34   :  { %55 = dma.hbm_to_vmem [thread:$0]  %s1072_s3, 4096, %s50_s15, [#allocation6], %s910_s21, %s910_s21, %s911_s22  }
  0x35   :  { %s856_s30 = scalar_lea.hbm %s1074_s5, 2048 }
  0x36   :  { %p857_p10 = scmp.ne.s32.totalorder %s1074_s5, %s856_s30  ;;  %p860_p11 = scmp.lt.u32.totalorder %s856_s30, %s1074_s5 }
  0x38   :  { %p862_p12 = pnand %p860_p11, %p857_p10 }
  0x3a   :  { %865 = shalt.err (!%p862_p12)
}
  0x3b   :  { %s866_s14 = scalar_lea.vmem %s1005_s17, 2048  ;;  %p871_p0 = scmp.lt.s32.totalorder %s1005_s17, %s1005_s17 }
  0x3c   :  { %p867_p13 = scmp.ne.s32.totalorder %s1005_s17, %s866_s14  ;;  %p872_p1 = scmp.lt.s32.totalorder %s866_s14, %s866_s14 }
  0x3e   :  { %p873_p2 = por %p872_p1, %p871_p0 }
  0x40   :  { %p874_p3 = pnand %p873_p2, %p867_p13 }
  0x42   :  { %877 = shalt.err (!%p874_p3)
}
  0x43   :  { %s914_s3 = smov 64   ;;  %s915_s15 = smov 4  }
  0x44   :  { %69 = dma.hbm_to_vmem [thread:$0]  %s1074_s5, 2048, %s1005_s17, [#allocation9], %s914_s3, %s914_s3, %s915_s15  }
  0x45   :  { %900 = dma.done.wait [#allocation3], 256  }
  0x46   :  { %901 = vsyncadd [#allocation3], 4294967040 }
  0x47   :  { %902 = dma.done.wait [#allocation6], 4352  }
  0x48   :  { %903 = vsyncadd [#allocation6], 4294962944 }
  0x49   :  { %904 = dma.done.wait [#allocation9], 2048  }
  0x4a   :  { %905 = vsyncadd [#allocation9], 4294965248  ;;  %v916_v0 = vmov 0   ;;  %v723_v1 = vld [vmem:[#allocation5 + $0x4] ss:$8 sps:$4 sm:$0xff]   ;;  %v89_v3 = vld [vmem:[#allocation2] sm:$0xff]  ;;  %v96_v49 = vlaneseq }
  0x4b   :  { %152 = vmatprep.mubr.bf16.mxu0 %v916_v0  ;;  %v725_v2 = vld [vmem:[#allocation5] ss:$8 sps:$4 sm:$0xff]   ;;  %v90_v4 = vld [vmem:[#allocation2 + $0x8] sm:$0xff]  ;;  %120 = vmatprep.subr.bf16.mxu0 %v723_v1  ;;  %vm116_vm0 = vcmask 130048   ;;  %v729_v8 = vld [vmem:[#allocation7 + $0x14] ss:$8 sps:$4 sm:$0xff]  }
  0x4c   :  { %v91_v5 = vpack.c.bf16 %v90_v4, %v89_v3  ;;  %v726_v6 = vld [vmem:[#allocation7 + $0x4] ss:$8 sps:$4 sm:$0xff]   ;;  %121 = vmatpush1.bf16.msra.mxu0 %v725_v2  ;;  %v728_v7 = vld [vmem:[#allocation7] ss:$8 sps:$4 sm:$0xff]   ;;  %v731_v9 = vld [vmem:[#allocation7 + $0x10] ss:$8 sps:$4 sm:$0xff]  }
  0x4d   :  { %373 = vmatprep.subr.bf16.mxu1 %v726_v6  ;;  %v732_v10 = vld [vmem:[#allocation7 + $0x24] ss:$8 sps:$4 sm:$0xff]   ;;  %v734_v11 = vld [vmem:[#allocation7 + $0x20] ss:$8 sps:$4 sm:$0xff]   ;;  %v735_v12 = vld [vmem:[#allocation7 + $0x34] ss:$8 sps:$4 sm:$0xff]  }
  0x4e   :  { %374 = vmatpush1.bf16.msra.mxu1 %v728_v7  ;;  %v737_v13 = vld [vmem:[#allocation7 + $0x30] ss:$8 sps:$4 sm:$0xff]   ;;  %v738_v14 = vld [vmem:[#allocation7 + $0x44] ss:$8 sps:$4 sm:$0xff]   ;;  %v740_v15 = vld [vmem:[#allocation7 + $0x40] ss:$8 sps:$4 sm:$0xff]  }
  0x4f   :  { %639 = vmatmul.mubr.msk.bf16.vlgmr.msra.gmra.mrb[0].mxu0 %vm116_vm0, %v91_v5  ;;  %375 = vmatprep.subr.bf16.mxu1 %v729_v8  ;;  %v741_v16 = vld [vmem:[#allocation7 + $0x54] ss:$8 sps:$4 sm:$0xff]   ;;  %v743_v17 = vld [vmem:[#allocation7 + $0x50] ss:$8 sps:$4 sm:$0xff]   ;;  %v744_v18 = vld [vmem:[#allocation7 + $0x64] ss:$8 sps:$4 sm:$0xff]  }
  0x50   :  { %v746_v19 = vld [vmem:[#allocation7 + $0x60] ss:$8 sps:$4 sm:$0xff]   ;;  %v747_v20 = vld [vmem:[#allocation7 + $0x74] ss:$8 sps:$4 sm:$0xff]   ;;  %v749_v21 = vld [vmem:[#allocation7 + $0x70] ss:$8 sps:$4 sm:$0xff]  }
  0x51   :  { %v750_v22 = vld [vmem:[#allocation7 + $0x84] ss:$8 sps:$4 sm:$0xff]   ;;  %v752_v23 = vld [vmem:[#allocation7 + $0x80] ss:$8 sps:$4 sm:$0xff]   ;;  %v753_v24 = vld [vmem:[#allocation7 + $0x94] ss:$8 sps:$4 sm:$0xff]  }
  0x52   :  { %376 = vmatpush1.bf16.msra.mxu1 %v731_v9  ;;  %v755_v25 = vld [vmem:[#allocation7 + $0x90] ss:$8 sps:$4 sm:$0xff]   ;;  %v756_v26 = vld [vmem:[#allocation7 + $0xa4] ss:$8 sps:$4 sm:$0xff]   ;;  %v758_v27 = vld [vmem:[#allocation7 + $0xa0] ss:$8 sps:$4 sm:$0xff]  }
  0x53   :  { %377 = vmatprep.subr.bf16.mxu1 %v732_v10  ;;  %v759_v28 = vld [vmem:[#allocation7 + $0xb4] ss:$8 sps:$4 sm:$0xff]   ;;  %v761_v29 = vld [vmem:[#allocation7 + $0xb0] ss:$8 sps:$4 sm:$0xff]   ;;  %v762_v30 = vld [vmem:[#allocation7 + $0xc4] ss:$8 sps:$4 sm:$0xff]  }
  0x54   :  { %v764_v31 = vld [vmem:[#allocation7 + $0xc0] ss:$8 sps:$4 sm:$0xff]   ;;  %v765_v32 = vld [vmem:[#allocation7 + $0xd4] ss:$8 sps:$4 sm:$0xff]   ;;  %v767_v33 = vld [vmem:[#allocation7 + $0xd0] ss:$8 sps:$4 sm:$0xff]  }
  0x55   :  { %v768_v34 = vld [vmem:[#allocation7 + $0xe4] ss:$8 sps:$4 sm:$0xff]   ;;  %v770_v35 = vld [vmem:[#allocation7 + $0xe0] ss:$8 sps:$4 sm:$0xff]   ;;  %v771_v36 = vld [vmem:[#allocation7 + $0xf4] ss:$8 sps:$4 sm:$0xff]  }
  0x56   :  { %378 = vmatpush1.bf16.msra.mxu1 %v734_v11  ;;  %v773_v37 = vld [vmem:[#allocation7 + $0xf0] ss:$8 sps:$4 sm:$0xff]   ;;  %v774_v38 = vld [vmem:[#allocation8 + $0x40] sm:$0xff]   ;;  %v776_v40 = vld [vmem:[#allocation8 + $0x48] sm:$0xff]   ;;  %v97_v50 = vshrl.u32 %v96_v49, 7  ;;  %s917_s0 = smov [#allocation10]  }
  0x57   :  { %379 = vmatprep.subr.bf16.mxu1 %v735_v12  ;;  %v775_v39 = vld [vmem:[#allocation8] sm:$0xff]   ;;  %691 = vmatprep.subr.bf16.mxu0 %v774_v38  ;;  %v777_v41 = vld [vmem:[#allocation8 + $0x8] sm:$0xff]   ;;  %v778_v42 = vld [vmem:[#allocation8 + $0x50] sm:$0xff]   ;;  %s623_s12 = sshll.u32 %s917_s0, 4  ;;  %s624_s12 = int_to_ptr.vmem [resolvable:$true] %s623_s12 }
  0x58   :  { %692 = vmatpush3.bf16.msra.mxu0 %v775_v39  ;;  %v779_v43 = vld [vmem:[#allocation8 + $0x10] sm:$0xff]   ;;  %v780_v44 = vld [vmem:[#allocation8 + $0x58] sm:$0xff]   ;;  %v782_v46 = vld [vmem:[#allocation8 + $0x60] sm:$0xff]   ;;  %v98_v51 = vsub.s32 0, %v97_v50  ;;  %v102_v53 = vsub.s32 1, %v97_v50  ;;  %p883_p5 = scmp.lt.s32.totalorder %s624_s12, %s624_s12 }
  0x59   :  { %693 = vmatprep.subr.bf16.mxu0 %v776_v40  ;;  %v781_v45 = vld [vmem:[#allocation8 + $0x18] sm:$0xff]   ;;  %v783_v47 = vld [vmem:[#allocation8 + $0x20] sm:$0xff]   ;;  %v784_v48 = vld [vmem:[#allocation8 + $0x68] sm:$0xff]  }
  0x5a   :  { %380 = vmatpush1.bf16.msra.mxu1 %v737_v13  ;;  %v94_v52 = vld [vmem:[%s1071_s2] sm:$0x3]  ;;  %v785_v6 = vld [vmem:[#allocation8 + $0x28] sm:$0xff]   ;;  %v786_v7 = vld [vmem:[#allocation8 + $0x70] sm:$0xff]  }
  0x5b   :  { %381 = vmatprep.subr.bf16.mxu1 %v738_v14  ;;  %v99_v54 = vrot.slane %v94_v52, %v98_v51  ;;  %v103_v55 = vrot.slane %v94_v52, %v102_v53  ;;  %v787_v8 = vld [vmem:[#allocation8 + $0x30] sm:$0xff]   ;;  %v788_v9 = vld [vmem:[#allocation8 + $0x78] sm:$0xff]   ;;  %v201_v11 = vld [vmem:[%s1073_s4] sm:$0x3] }
  0x5c   :  { %694 = vmatpush3.bf16.msra.mxu0 %v777_v41  ;;  %v789_v10 = vld [vmem:[#allocation8 + $0x38] sm:$0xff]   ;;  %v206_v12 = vrot.slane %v201_v11, %v98_v51  ;;  %v210_v13 = vrot.slane %v201_v11, %v102_v53 }
  0x5d   :  { %695 = vmatprep.subr.bf16.mxu0 %v778_v42 }
  0x5e   :  { %382 = vmatpush1.bf16.msra.mxu1 %v740_v15 }
  0x5f   :  { %383 = vmatprep.subr.bf16.mxu1 %v741_v16 }
  0x60   :  { %696 = vmatpush3.bf16.msra.mxu0 %v779_v43 }
  0x61   :  { %697 = vmatprep.subr.bf16.mxu0 %v780_v44 }
  0x62   :  { %384 = vmatpush1.bf16.msra.mxu1 %v743_v17 }
  0x63   :  { %385 = vmatprep.subr.bf16.mxu1 %v744_v18 }
  0x64   :  { %698 = vmatpush3.bf16.msra.mxu0 %v781_v45 }
  0x65   :  { %699 = vmatprep.subr.bf16.mxu0 %v782_v46 }
  0x66   :  { %386 = vmatpush1.bf16.msra.mxu1 %v746_v19 }
  0x67   :  { %387 = vmatprep.subr.bf16.mxu1 %v747_v20 }
  0x68   :  { %700 = vmatpush3.bf16.msra.mxu0 %v783_v47 }
  0x69   :  { %701 = vmatprep.subr.bf16.mxu0 %v784_v48 }
  0x6a   :  { %388 = vmatpush1.bf16.msra.mxu1 %v749_v21 }
  0x6b   :  { %389 = vmatprep.subr.bf16.mxu1 %v750_v22 }
  0x6c   :  { %702 = vmatpush3.bf16.msra.mxu0 %v785_v6 }
  0x6d   :  { %703 = vmatprep.subr.bf16.mxu0 %v786_v7 }
  0x6e   :  { %390 = vmatpush1.bf16.msra.mxu1 %v752_v23 }
  0x6f   :  { %391 = vmatprep.subr.bf16.mxu1 %v753_v24 }
  0x70   :  { %704 = vmatpush3.bf16.msra.mxu0 %v787_v8 }
  0x71   :  { %705 = vmatprep.subr.bf16.mxu0 %v788_v9 }
  0x72   :  { %392 = vmatpush1.bf16.msra.mxu1 %v755_v25 }
  0x73   :  { %393 = vmatprep.subr.bf16.mxu1 %v756_v26 }
  0x74   :  { %706 = vmatpush3.bf16.msra.mxu0 %v789_v10 }
  0x76   :  { %394 = vmatpush1.bf16.msra.mxu1 %v758_v27 }
  0x77   :  { %395 = vmatprep.subr.bf16.mxu1 %v759_v28 }
  0x7a   :  { %396 = vmatpush1.bf16.msra.mxu1 %v761_v29  ;;  %v672_v29 = vld [vmem:[%s1075_s6] ss:$0 sm:$0xff]  ;;  %s878_s6 = scalar_lea.vmem %s624_s12, 256 }
  0x7b   :  { %397 = vmatprep.subr.bf16.mxu1 %v762_v30  ;;  %p879_p4 = scmp.ne.s32.totalorder %s624_s12, %s878_s6  ;;  %p884_p6 = scmp.lt.s32.totalorder %s878_s6, %s878_s6 }
  0x7d   :  { %p885_p7 = por %p884_p6, %p883_p5 }
  0x7e   :  { %398 = vmatpush1.bf16.msra.mxu1 %v764_v31 }
  0x7f   :  { %399 = vmatprep.subr.bf16.mxu1 %v765_v32  ;;  %p886_p8 = pnand %p885_p7, %p879_p4 }
  0x82   :  { %400 = vmatpush1.bf16.msra.mxu1 %v767_v33  ;;  %v689_v33 = vld [vmem:[%s1076_s7] ss:$0 sm:$0xff] }
  0x83   :  { %401 = vmatprep.subr.bf16.mxu1 %v768_v34 }
  0x86   :  { %402 = vmatpush1.bf16.msra.mxu1 %v770_v35 }
  0x87   :  { %403 = vmatprep.subr.bf16.mxu1 %v771_v36 }
  0x8a   :  { %404 = vmatpush1.bf16.msra.mxu1 %v773_v37  ;;  %v690_v37 = vld [vmem:[%s1077_s8] ss:$0 sm:$0xff] }
 0x122   :  { %v154_v56 = vpop.f32.mrb[0].mxu0 }
 0x123   :  { %v155_v57 = vadd.f32 %v154_v56, %v99_v54  ;;  %v156_v58 = vpop.f32.mrb[1].mxu0 }
 0x124   :  { %v157_v59 = vadd.f32 %v156_v58, %v103_v55  ;;  %v158_v60 = vpop.f32.mrb[2].mxu0 }
 0x125   :  { %v159_v61 = vadd.f32 %v158_v60, %v99_v54  ;;  %v160_v62 = vpop.f32.mrb[3].mxu0  ;;  %v163_v0 = vmax.f32 %v155_v57, 0.0 }
 0x126   :  { %v161_v63 = vadd.f32 %v160_v62, %v103_v55  ;;  %v164_v2 = vmax.f32 %v157_v59, 0.0 }
 0x127   :  { %v165_v1 = vmax.f32 %v159_v61, 0.0 }
 0x128   :  { %v166_v3 = vmax.f32 %v161_v63, 0.0 }
 0x129   :  { %v167_v4 = vpack.c.bf16 %v165_v1, %v163_v0 }
 0x12a   :  { %v168_v5 = vpack.c.bf16 %v166_v3, %v164_v2 }
 0x12c   :  { %405 = vmatprep.mubr.bf16.mxu1 %v168_v5 }
 0x12d   :  { %406 = vmatmul.mubr.bf16.vlgmr.msra.gmra.mrb[0].mxu1 %v167_v4 }
 0x200   :  { %v407_v14 = vpop.f32.mrb[0].mxu1 }
 0x201   :  { %v408_v15 = vadd.f32 %v407_v14, %v206_v12  ;;  %v409_v16 = vpop.f32.mrb[1].mxu1 }
 0x202   :  { %v410_v17 = vadd.f32 %v409_v16, %v210_v13  ;;  %v411_v18 = vpop.f32.mrb[2].mxu1 }
 0x203   :  { %v412_v19 = vadd.f32 %v411_v18, %v206_v12  ;;  %v413_v20 = vpop.f32.mrb[3].mxu1  ;;  %v416_v22 = vmax.f32 %v408_v15, 0.0 }
 0x204   :  { %v414_v21 = vadd.f32 %v413_v20, %v210_v13  ;;  %v417_v24 = vmax.f32 %v410_v17, 0.0 }
 0x205   :  { %v418_v23 = vmax.f32 %v412_v19, 0.0 }
 0x206   :  { %v419_v25 = vmax.f32 %v414_v21, 0.0 }
 0x207   :  { %v420_v26 = vpack.c.bf16 %v418_v23, %v416_v22 }
 0x208   :  { %v421_v27 = vpack.c.bf16 %v419_v25, %v417_v24 }
 0x20a   :  { %589 = vmatprep.mubr.bf16.mxu0 %v421_v27 }
 0x20b   :  { %590 = vmatmul.mubr.bf16.vlgmr.msra.gmra.mrb[4].mxu0 %v420_v26 }
 0x2de   :  { %v707_v28 = vpop.f32.mrb[4].mxu0 }
 0x2df   :  { %v708_v30 = vpop.f32.mrb[5].mxu0 }
 0x2e0   :  { %v709_v31 = vadd.f32 %v708_v30, %v707_v28  ;;  %v710_v32 = vpop.f32.mrb[6].mxu0 }
 0x2e1   :  { %v711_v34 = vpop.f32.mrb[7].mxu0 }
 0x2e2   :  { %v592_v35 = vadd.f32 %v709_v31, %v672_v29  ;;  %v712_v36 = vadd.f32 %v711_v34, %v710_v32 }
 0x2e4   :  { %v605_v38 = vmax.f32 %v592_v35, %v689_v33  ;;  %v595_v39 = vadd.f32 %v712_v36, %v672_v29 }
 0x2e6   :  { %v606_v40 = vmax.f32 %v595_v39, %v689_v33  ;;  %v614_v41 = vmin.f32 %v605_v38, %v690_v37 }
 0x2e8   :  { %v615_v42 = vmin.f32 %v606_v40, %v690_v37  ;;  %616 = vst [vmem:[#allocation10] sm:$0xff] %v614_v41 }
 0x2ea   :  { %617 = vst [vmem:[#allocation10 + $0x8] sm:$0xff] %v615_v42 }
 0x2eb   :  { %889 = shalt.err (!%p886_p8)
}
 0x2ec   :  { %s890_s8 = scalar_lea.hbm %s1078_s9, 256 }
 0x2ed   :  { %p891_p9 = scmp.ne.s32.totalorder %s1078_s9, %s890_s8  ;;  %p894_p10 = scmp.lt.u32.totalorder %s890_s8, %s1078_s9 }
 0x2ef   :  { %p896_p11 = pnand %p894_p10, %p891_p9 }
 0x2f1   :  { %899 = shalt.err (!%p896_p11)
}
 0x2f2   :  { %629 = dma.vmem_to_hbm [thread:$0]  %s624_s12, 256, %s1078_s9, [#allocation4], %s910_s21, %s910_s21, %s911_s22  }
 0x2f3   :  { %906 = dma.done.wait [#allocation4], 256  }
 0x2f4   :  { %907 = vsyncadd [#allocation4], 4294967040 }
 0x2f5   :  { %633 = vsyncpa [#allocation3], 1 }
 0x2f6   :  { %634 = vsyncpa [#allocation6], 1 }
 0x2f7   :  { %635 = vsyncpa [#allocation9], 1 }
 0x2f8   :  { %636 = vsyncpa [#allocation4], 1 }

</bundles_post_ra>
